<compile_context>
chip_gen: v7x
topology: tpu7x:2x2x1
jax: 0.10.0
libtpu: 0.0.40
codegen_flags: <defaults>
</compile_context>

<pallas_src>
import functools
import math

import jax
import jax.numpy as jnp
from jax.experimental import pallas as pl
from jax.experimental.pallas import tpu as pltpu

EPS = 1e-5  # nn.LayerNorm default eps


# ---------------------------------------------------------------------------
# Fused kernel: Linear(+folded constant bias)+ReLU -> [ResMLP]*num_res -> Linear
# ---------------------------------------------------------------------------
def _fused_mlpford_kernel(x_ref, cb_ref, w0x_ref, wres_ref, vecs_ref, wout_ref,
                          o_ref, *, num_res, hidden, d_out, matmul_dtype):
    def mx(a):  # cast activations for the MXU only when a narrower dtype is requested
        return a if a.dtype == matmul_dtype else a.astype(matmul_dtype)

    # First Linear + ReLU.  cb already holds (constant @ w0_c + b0) tiled to tm rows,
    # so the original concat([x, constant_expanded]) is folded away entirely.
    h = jnp.dot(mx(x_ref[...]), w0x_ref[...], preferred_element_type=jnp.float32)
    h = jnp.maximum(h + cb_ref[...], 0.0)

    # ResMLP blocks (static unroll: num_res known at trace time).
    for r in range(num_res):
        gamma = vecs_ref[4 * r + 0:4 * r + 1, :hidden]
        beta = vecs_ref[4 * r + 1:4 * r + 2, :hidden]
        b1 = vecs_ref[4 * r + 2:4 * r + 3, :hidden]
        b2 = vecs_ref[4 * r + 3:4 * r + 4, :hidden]
        # LayerNorm -- element-wise math kept in f32 (v5e-safe).
        mu = jnp.mean(h, axis=-1, keepdims=True)
        xc = h - mu
        var = jnp.mean(xc * xc, axis=-1, keepdims=True)
        xn = xc * jax.lax.rsqrt(var + EPS) * gamma + beta
        # Linear -> ReLU -> Linear, residual add (matmuls accumulate in f32).
        t = jnp.dot(mx(xn), wres_ref[2 * r], preferred_element_type=jnp.float32)
        t = jnp.maximum(t + b1, 0.0)
        t = jnp.dot(mx(t), wres_ref[2 * r + 1], preferred_element_type=jnp.float32)
        h = h + t + b2

    # Output Linear (narrow store happens exactly once per row tile).
    y = jnp.dot(mx(h), wout_ref[...], preferred_element_type=jnp.float32)
    b_out = vecs_ref[4 * num_res:4 * num_res + 1, :d_out]
    o_ref[...] = (y + b_out).astype(o_ref.dtype)


def _resident(shape):
    """Full-extent block, resident in VMEM across the whole row grid."""
    nd = len(shape)
    return pl.BlockSpec(shape, lambda i: (0,) * nd)


# ---------------------------------------------------------------------------
# Wrapper: single pallas_call over row tiles
# ---------------------------------------------------------------------------
def mlpford_forward(params, x, constant, *, tm=None, matmul_dtype=jnp.float32):
    """x: (B, S, Dx), constant: (1, S, Dc) -> (B, S, in_features[-1])."""
    B, S, Dx = x.shape
    Dc = constant.shape[-1]
    w0, b0 = params["w0"], params["b0"]
    res = params["res"]
    w_out, b_out = params["w_out"], params["b_out"]
    D0, H = w0.shape
    D_out = w_out.shape[1]
    assert D0 == Dx + Dc, "w0 input dim must equal Dx + Dc"
    num_res = len(res)
    # The original nn.Sequential only type-checks when every middle width equals H;
    # the packed-parameter layout relies on exactly that.
    for (gamma, beta, w1, b1, w2, b2) in res:
        assert gamma.shape == (H,) and beta.shape == (H,)
        assert w1.shape == (H, H) and b1.shape == (H,)
        assert w2.shape == (H, H) and b2.shape == (H,)
    assert w_out.shape[0] == H and b_out.shape == (D_out,)

    N = B * S
    # Row-tile size: multiple of S (so one resident per-tile constant-bias block works
    # for every tile) and of 8 (sublane rule); capped at 512 so large N gets >= 2 grid
    # steps (v7x dual TensorCore) while staying far inside VMEM.
    # TODO(synk): for pathologically large/odd S (lcm(S,8) in the many-thousands) a
    # fallback tiling would be needed; not relevant at these shapes.
    if tm is None:
        cap = 512
        base = S * 8 // math.gcd(S, 8)          # lcm(S, 8)
        if N <= max(cap, base):
            tm = N                              # single full-extent tile
        else:
            tm = max(base, (cap // base) * base)
    assert tm % S == 0 and (tm % 8 == 0 or tm == N)
    grid = (pl.cdiv(N, tm),)                    # ragged tail handled by Pallas masking

    # Fold the broadcast+concat of `constant` into the first layer:
    #   relu([x, c] @ w0 + b0) == relu(x @ w0[:Dx] + (c @ w0[Dx:] + b0))
    w0_x = w0[:Dx].astype(matmul_dtype)
    cb = (constant[0] @ w0[Dx:] + b0).astype(jnp.float32)      # (S, H), tiny
    cb_tile = jnp.tile(cb, (tm // S, 1))                       # (tm, H), resident

    # Pack the many tiny per-layer parameters into 3 operands.
    vmax = max(H, D_out)
    vec_rows = []
    for (gamma, beta, w1, b1, w2, b2) in res:
        vec_rows += [gamma, beta, b1, b2]
    vec_rows.append(b_out)
    vecs = jnp.stack(
        [jnp.pad(v.astype(jnp.float32), (0, vmax - v.shape[0])) for v in vec_rows])
    if num_res > 0:
        wres = jnp.stack([w for (_, _, w1, _, w2, _) in res for w in (w1, w2)])
    else:
        wres = jnp.zeros((1, H, H), w0.dtype)   # unused dummy
    wres = wres.astype(matmul_dtype)
    w_out_c = w_out.astype(matmul_dtype)

    x2d = x.reshape(N, Dx)                      # pure reshape, no copy / no concat

    kernel = functools.partial(_fused_mlpford_kernel, num_res=num_res,
                               hidden=H, d_out=D_out, matmul_dtype=matmul_dtype)
    out = pl.pallas_call(
        kernel,
        out_shape=jax.ShapeDtypeStruct((N, D_out), x.dtype),
        grid=grid,
        in_specs=[
            pl.BlockSpec((tm, Dx), lambda i: (i, 0)),   # row-tiled input
            _resident(cb_tile.shape),                   # (tm, H) constant bias
            _resident(w0_x.shape),                      # (Dx, H)
            _resident(wres.shape),                      # (2R, H, H)
            _resident(vecs.shape),                      # (4R+1, Vmax)
            _resident(w_out_c.shape),                   # (H, D_out)
        ],
        out_specs=pl.BlockSpec((tm, D_out), lambda i: (i, 0)),
        compiler_params=pltpu.CompilerParams(
            dimension_semantics=("parallel",),
        ),
    )(x2d, cb_tile, w0_x, wres, vecs, w_out_c)
    return out.reshape(B, S, D_out)


# ---------------------------------------------------------------------------
# Parameters (deterministic, matching mlpford(inFeatures) structure)
# ---------------------------------------------------------------------------
def init_params(key, in_features):
    num_layers = len(in_features)
    params = {}

    def lin_init(k, fan_in, fan_out):
        kw, kb = jax.random.split(k)
        scale = 1.0 / jnp.sqrt(fan_in)
        w = jax.random.uniform(kw, (fan_in, fan_out), jnp.float32, -scale, scale)
        b = jax.random.uniform(kb, (fan_out,), jnp.float32, -scale, scale)
        return w, b

    key, k0 = jax.random.split(key)
    params["w0"], params["b0"] = lin_init(k0, in_features[0], in_features[1])

    res = []
    for i in range(1, num_layers - 2):
        d, h = in_features[i], in_features[i + 1]
        key, k1, k2 = jax.random.split(key, 3)
        gamma = jnp.ones((d,), jnp.float32)   # nn.LayerNorm default weight
        beta = jnp.zeros((d,), jnp.float32)   # nn.LayerNorm default bias
        w1, b1 = lin_init(k1, d, h)
        w2, b2 = lin_init(k2, h, d)
        res.append((gamma, beta, w1, b1, w2, b2))
    params["res"] = res

    key, kf = jax.random.split(key)
    params["w_out"], params["b_out"] = lin_init(kf, in_features[-2], in_features[-1])
    return params


# ---------------------------------------------------------------------------
# Pure-JAX reference (mirrors the PyTorch module exactly)
# ---------------------------------------------------------------------------
def mlpford_reference(params, x, constant):
    B, S, _ = x.shape
    const_exp = jnp.broadcast_to(constant, (B,) + constant.shape[1:])
    h = jnp.concatenate([x, const_exp], axis=-1)
    h = jnp.maximum(h @ params["w0"] + params["b0"], 0.0)
    for gamma, beta, w1, b1, w2, b2 in params["res"]:
        mu = jnp.mean(h, -1, keepdims=True)
        var = jnp.mean((h - mu) ** 2, -1, keepdims=True)
        xn = (h - mu) / jnp.sqrt(var + EPS) * gamma + beta
        h = h + jnp.maximum(xn @ w1 + b1, 0.0) @ w2 + b2
    return h @ params["w_out"] + params["b_out"]


if __name__ == "__main__":
    key = jax.random.PRNGKey(0)
    # inFeatures = [12, 32, 32, 32, 6]:
    #   Linear(12->32), ReLU, ResMLP(32,32), ResMLP(32,32), Linear(32->6)
    in_features = [12, 32, 32, 32, 6]
    B, S, Dx, Dc = 2, 8, 8, 4
    assert Dx + Dc == in_features[0]

    kx, kc, kp = jax.random.split(key, 3)
    x = jax.random.normal(kx, (B, S, Dx), jnp.float32)
    constant = jax.random.normal(kc, (1, S, Dc), jnp.float32)
    params = init_params(kp, in_features)

    ref = jax.block_until_ready(mlpford_reference(params, x, constant))

    # f32 MXU path (bit-for-bit-ish vs. reference).
    fwd_f32 = jax.jit(lambda p, xi, c: mlpford_forward(p, xi, c))
    out = jax.block_until_ready(fwd_f32(params, x, constant))
    assert out.shape == (B, S, in_features[-1])
    assert jnp.allclose(out, ref, atol=1e-4, rtol=1e-4)

    # bf16 MXU path (v6e/v7x-friendly): f32 accumulation + f32 element-wise math,
    # so only a small precision loss vs. the f32 reference.
    fwd_bf16 = jax.jit(
        lambda p, xi, c: mlpford_forward(p, xi, c, matmul_dtype=jnp.bfloat16))
    out_bf16 = jax.block_until_ready(fwd_bf16(params, x, constant))
    assert jnp.allclose(out_bf16, ref, atol=5e-2, rtol=5e-2)

    print("KERNEL_OK")
</pallas_src>

<mosaic_0001>
module attributes {stable_mosaic.version = 11 : i64} {
  func.func @_fused_mlpford_kernel(%arg0: i32, %arg1: memref<16x8xf32, #tpu.memory_space<vmem>>, %arg2: memref<16x32xf32, #tpu.memory_space<vmem>>, %arg3: memref<8x32xf32, #tpu.memory_space<vmem>>, %arg4: memref<4x32x32xf32, #tpu.memory_space<vmem>>, %arg5: memref<9x32xf32, #tpu.memory_space<vmem>>, %arg6: memref<32x6xf32, #tpu.memory_space<vmem>>, %arg7: memref<16x6xf32, #tpu.memory_space<vmem>>) attributes {dimension_semantics = [#tpu.dimension_semantics<parallel>], iteration_bounds = array<i64: 1>, scalar_prefetch = 0 : i64, scratch_operands = 0 : i64, tpu.core_type = #tpu.core_type<tc>, window_params = [{transform_indices = @transform_0, window_bounds = array<i64: 16, 8>}, {pipeline_mode = #tpu.pipeline_mode<synchronous>, transform_indices = @transform_1, window_bounds = array<i64: 16, 32>}, {pipeline_mode = #tpu.pipeline_mode<synchronous>, transform_indices = @transform_2, window_bounds = array<i64: 8, 32>}, {pipeline_mode = #tpu.pipeline_mode<synchronous>, transform_indices = @transform_3, window_bounds = array<i64: 4, 32, 32>}, {pipeline_mode = #tpu.pipeline_mode<synchronous>, transform_indices = @transform_4, window_bounds = array<i64: 9, 32>}, {pipeline_mode = #tpu.pipeline_mode<synchronous>, transform_indices = @transform_5, window_bounds = array<i64: 32, 6>}, {transform_indices = @transform_6, window_bounds = array<i64: 16, 6>}]} {
    %c0 = arith.constant 0 : index
    %c0_0 = arith.constant 0 : index
    %0 = vector.load %arg1[%c0, %c0_0] : memref<16x8xf32, #tpu.memory_space<vmem>>, vector<16x8xf32>
    %c0_1 = arith.constant 0 : index
    %c0_2 = arith.constant 0 : index
    %1 = vector.load %arg3[%c0_1, %c0_2] : memref<8x32xf32, #tpu.memory_space<vmem>>, vector<8x32xf32>
    %cst = arith.constant dense<0.000000e+00> : vector<16x32xf32>
    %2 = tpu.matmul %0, %1, %cst {dimension_numbers = #tpu.dot_dimension_numbers<[1], [0], [0], [1], [0, 0, 1, 1], [], []>} : vector<16x8xf32>, vector<8x32xf32>, vector<16x32xf32> -> vector<16x32xf32>
    %c0_3 = arith.constant 0 : index
    %c0_4 = arith.constant 0 : index
    %3 = vector.load %arg2[%c0_3, %c0_4] : memref<16x32xf32, #tpu.memory_space<vmem>>, vector<16x32xf32>
    %4 = arith.addf %2, %3 : vector<16x32xf32>
    %cst_5 = arith.constant 0.000000e+00 : f32
    %5 = vector.broadcast %cst_5 : f32 to vector<16x32xf32>
    %6 = arith.maximumf %4, %5 : vector<16x32xf32>
    %c0_6 = arith.constant 0 : index
    %c0_7 = arith.constant 0 : index
    %7 = vector.load %arg5[%c0_6, %c0_7] : memref<9x32xf32, #tpu.memory_space<vmem>>, vector<1x32xf32>
    %c1 = arith.constant 1 : index
    %c0_8 = arith.constant 0 : index
    %8 = vector.load %arg5[%c1, %c0_8] : memref<9x32xf32, #tpu.memory_space<vmem>>, vector<1x32xf32>
    %c2 = arith.constant 2 : index
    %c0_9 = arith.constant 0 : index
    %9 = vector.load %arg5[%c2, %c0_9] : memref<9x32xf32, #tpu.memory_space<vmem>>, vector<1x32xf32>
    %c3 = arith.constant 3 : index
    %c0_10 = arith.constant 0 : index
    %10 = vector.load %arg5[%c3, %c0_10] : memref<9x32xf32, #tpu.memory_space<vmem>>, vector<1x32xf32>
    %cst_11 = arith.constant dense<0.000000e+00> : vector<16xf32>
    %11 = vector.multi_reduction <add>, %6, %cst_11 [1] : vector<16x32xf32> to vector<16xf32>
    %12 = vector.shape_cast %11 : vector<16xf32> to vector<16x1xf32>
    %cst_12 = arith.constant 3.200000e+01 : f32
    %13 = vector.broadcast %cst_12 : f32 to vector<16x1xf32>
    %14 = arith.divf %12, %13 : vector<16x1xf32>
    %15 = vector.broadcast %14 : vector<16x1xf32> to vector<16x32xf32>
    %16 = arith.subf %6, %15 : vector<16x32xf32>
    %17 = arith.mulf %16, %16 : vector<16x32xf32>
    %cst_13 = arith.constant dense<0.000000e+00> : vector<16xf32>
    %18 = vector.multi_reduction <add>, %17, %cst_13 [1] : vector<16x32xf32> to vector<16xf32>
    %19 = vector.shape_cast %18 : vector<16xf32> to vector<16x1xf32>
    %cst_14 = arith.constant 3.200000e+01 : f32
    %20 = vector.broadcast %cst_14 : f32 to vector<16x1xf32>
    %21 = arith.divf %19, %20 : vector<16x1xf32>
    %cst_15 = arith.constant 9.99999974E-6 : f32
    %22 = vector.broadcast %cst_15 : f32 to vector<16x1xf32>
    %23 = arith.addf %21, %22 : vector<16x1xf32>
    %24 = math.rsqrt %23 : vector<16x1xf32>
    %25 = vector.broadcast %24 : vector<16x1xf32> to vector<16x32xf32>
    %26 = arith.mulf %16, %25 : vector<16x32xf32>
    %27 = vector.broadcast %7 : vector<1x32xf32> to vector<16x32xf32>
    %28 = arith.mulf %26, %27 : vector<16x32xf32>
    %29 = vector.broadcast %8 : vector<1x32xf32> to vector<16x32xf32>
    %30 = arith.addf %28, %29 : vector<16x32xf32>
    %c0_16 = arith.constant 0 : index
    %c0_17 = arith.constant 0 : index
    %c0_18 = arith.constant 0 : index
    %31 = vector.load %arg4[%c0_16, %c0_17, %c0_18] : memref<4x32x32xf32, #tpu.memory_space<vmem>>, vector<1x32x32xf32>
    %32 = vector.shape_cast %31 : vector<1x32x32xf32> to vector<32x32xf32>
    %cst_19 = arith.constant dense<0.000000e+00> : vector<16x32xf32>
    %33 = tpu.matmul %30, %32, %cst_19 {dimension_numbers = #tpu.dot_dimension_numbers<[1], [0], [0], [1], [0, 0, 1, 1], [], []>} : vector<16x32xf32>, vector<32x32xf32>, vector<16x32xf32> -> vector<16x32xf32>
    %34 = vector.broadcast %9 : vector<1x32xf32> to vector<16x32xf32>
    %35 = arith.addf %33, %34 : vector<16x32xf32>
    %cst_20 = arith.constant 0.000000e+00 : f32
    %36 = vector.broadcast %cst_20 : f32 to vector<16x32xf32>
    %37 = arith.maximumf %35, %36 : vector<16x32xf32>
    %c1_21 = arith.constant 1 : index
    %c0_22 = arith.constant 0 : index
    %c0_23 = arith.constant 0 : index
    %38 = vector.load %arg4[%c1_21, %c0_22, %c0_23] : memref<4x32x32xf32, #tpu.memory_space<vmem>>, vector<1x32x32xf32>
    %39 = vector.shape_cast %38 : vector<1x32x32xf32> to vector<32x32xf32>
    %cst_24 = arith.constant dense<0.000000e+00> : vector<16x32xf32>
    %40 = tpu.matmul %37, %39, %cst_24 {dimension_numbers = #tpu.dot_dimension_numbers<[1], [0], [0], [1], [0, 0, 1, 1], [], []>} : vector<16x32xf32>, vector<32x32xf32>, vector<16x32xf32> -> vector<16x32xf32>
    %41 = arith.addf %6, %40 : vector<16x32xf32>
    %42 = vector.broadcast %10 : vector<1x32xf32> to vector<16x32xf32>
    %43 = arith.addf %41, %42 : vector<16x32xf32>
    %c4 = arith.constant 4 : index
    %c0_25 = arith.constant 0 : index
    %44 = vector.load %arg5[%c4, %c0_25] : memref<9x32xf32, #tpu.memory_space<vmem>>, vector<1x32xf32>
    %c5 = arith.constant 5 : index
    %c0_26 = arith.constant 0 : index
    %45 = vector.load %arg5[%c5, %c0_26] : memref<9x32xf32, #tpu.memory_space<vmem>>, vector<1x32xf32>
    %c6 = arith.constant 6 : index
    %c0_27 = arith.constant 0 : index
    %46 = vector.load %arg5[%c6, %c0_27] : memref<9x32xf32, #tpu.memory_space<vmem>>, vector<1x32xf32>
    %c7 = arith.constant 7 : index
    %c0_28 = arith.constant 0 : index
    %47 = vector.load %arg5[%c7, %c0_28] : memref<9x32xf32, #tpu.memory_space<vmem>>, vector<1x32xf32>
    %cst_29 = arith.constant dense<0.000000e+00> : vector<16xf32>
    %48 = vector.multi_reduction <add>, %43, %cst_29 [1] : vector<16x32xf32> to vector<16xf32>
    %49 = vector.shape_cast %48 : vector<16xf32> to vector<16x1xf32>
    %cst_30 = arith.constant 3.200000e+01 : f32
    %50 = vector.broadcast %cst_30 : f32 to vector<16x1xf32>
    %51 = arith.divf %49, %50 : vector<16x1xf32>
    %52 = vector.broadcast %51 : vector<16x1xf32> to vector<16x32xf32>
    %53 = arith.subf %43, %52 : vector<16x32xf32>
    %54 = arith.mulf %53, %53 : vector<16x32xf32>
    %cst_31 = arith.constant dense<0.000000e+00> : vector<16xf32>
    %55 = vector.multi_reduction <add>, %54, %cst_31 [1] : vector<16x32xf32> to vector<16xf32>
    %56 = vector.shape_cast %55 : vector<16xf32> to vector<16x1xf32>
    %cst_32 = arith.constant 3.200000e+01 : f32
    %57 = vector.broadcast %cst_32 : f32 to vector<16x1xf32>
    %58 = arith.divf %56, %57 : vector<16x1xf32>
    %cst_33 = arith.constant 9.99999974E-6 : f32
    %59 = vector.broadcast %cst_33 : f32 to vector<16x1xf32>
    %60 = arith.addf %58, %59 : vector<16x1xf32>
    %61 = math.rsqrt %60 : vector<16x1xf32>
    %62 = vector.broadcast %61 : vector<16x1xf32> to vector<16x32xf32>
    %63 = arith.mulf %53, %62 : vector<16x32xf32>
    %64 = vector.broadcast %44 : vector<1x32xf32> to vector<16x32xf32>
    %65 = arith.mulf %63, %64 : vector<16x32xf32>
    %66 = vector.broadcast %45 : vector<1x32xf32> to vector<16x32xf32>
    %67 = arith.addf %65, %66 : vector<16x32xf32>
    %c2_34 = arith.constant 2 : index
    %c0_35 = arith.constant 0 : index
    %c0_36 = arith.constant 0 : index
    %68 = vector.load %arg4[%c2_34, %c0_35, %c0_36] : memref<4x32x32xf32, #tpu.memory_space<vmem>>, vector<1x32x32xf32>
    %69 = vector.shape_cast %68 : vector<1x32x32xf32> to vector<32x32xf32>
    %cst_37 = arith.constant dense<0.000000e+00> : vector<16x32xf32>
    %70 = tpu.matmul %67, %69, %cst_37 {dimension_numbers = #tpu.dot_dimension_numbers<[1], [0], [0], [1], [0, 0, 1, 1], [], []>} : vector<16x32xf32>, vector<32x32xf32>, vector<16x32xf32> -> vector<16x32xf32>
    %71 = vector.broadcast %46 : vector<1x32xf32> to vector<16x32xf32>
    %72 = arith.addf %70, %71 : vector<16x32xf32>
    %cst_38 = arith.constant 0.000000e+00 : f32
    %73 = vector.broadcast %cst_38 : f32 to vector<16x32xf32>
    %74 = arith.maximumf %72, %73 : vector<16x32xf32>
    %c3_39 = arith.constant 3 : index
    %c0_40 = arith.constant 0 : index
    %c0_41 = arith.constant 0 : index
    %75 = vector.load %arg4[%c3_39, %c0_40, %c0_41] : memref<4x32x32xf32, #tpu.memory_space<vmem>>, vector<1x32x32xf32>
    %76 = vector.shape_cast %75 : vector<1x32x32xf32> to vector<32x32xf32>
    %cst_42 = arith.constant dense<0.000000e+00> : vector<16x32xf32>
    %77 = tpu.matmul %74, %76, %cst_42 {dimension_numbers = #tpu.dot_dimension_numbers<[1], [0], [0], [1], [0, 0, 1, 1], [], []>} : vector<16x32xf32>, vector<32x32xf32>, vector<16x32xf32> -> vector<16x32xf32>
    %78 = arith.addf %43, %77 : vector<16x32xf32>
    %79 = vector.broadcast %47 : vector<1x32xf32> to vector<16x32xf32>
    %80 = arith.addf %78, %79 : vector<16x32xf32>
    %c0_43 = arith.constant 0 : index
    %c0_44 = arith.constant 0 : index
    %81 = vector.load %arg6[%c0_43, %c0_44] : memref<32x6xf32, #tpu.memory_space<vmem>>, vector<32x6xf32>
    %cst_45 = arith.constant dense<0.000000e+00> : vector<16x6xf32>
    %82 = tpu.matmul %80, %81, %cst_45 {dimension_numbers = #tpu.dot_dimension_numbers<[1], [0], [0], [1], [0, 0, 1, 1], [], []>} : vector<16x32xf32>, vector<32x6xf32>, vector<16x6xf32> -> vector<16x6xf32>
    %c8 = arith.constant 8 : index
    %c0_46 = arith.constant 0 : index
    %83 = vector.load %arg5[%c8, %c0_46] : memref<9x32xf32, #tpu.memory_space<vmem>>, vector<1x6xf32>
    %84 = vector.broadcast %83 : vector<1x6xf32> to vector<16x6xf32>
    %85 = arith.addf %82, %84 : vector<16x6xf32>
    %c0_47 = arith.constant 0 : index
    %c0_48 = arith.constant 0 : index
    %86 = vector.load %arg7[%c0_47, %c0_48] : memref<16x6xf32, #tpu.memory_space<vmem>>, vector<16x6xf32>
    tpu.vector_store %arg7[%c0_47, %c0_48], %85 {strides = array<i32>} : memref<16x6xf32, #tpu.memory_space<vmem>>, vector<16x6xf32>,
    return
  }
  func.func @transform_0(%arg0: i32) -> (i32, i32) {
    %c0_i32 = arith.constant 0 : i32
    %c0_i32_0 = arith.constant 0 : i32
    return %arg0, %c0_i32 : i32, i32
  }
  func.func @transform_1(%arg0: i32) -> (i32, i32) {
    %c0_i32 = arith.constant 0 : i32
    %c0_i32_0 = arith.constant 0 : i32
    %c0_i32_1 = arith.constant 0 : i32
    return %c0_i32, %c0_i32_0 : i32, i32
  }
  func.func @transform_2(%arg0: i32) -> (i32, i32) {
    %c0_i32 = arith.constant 0 : i32
    %c0_i32_0 = arith.constant 0 : i32
    %c0_i32_1 = arith.constant 0 : i32
    return %c0_i32, %c0_i32_0 : i32, i32
  }
  func.func @transform_3(%arg0: i32) -> (i32, i32, i32) {
    %c0_i32 = arith.constant 0 : i32
    %c0_i32_0 = arith.constant 0 : i32
    %c0_i32_1 = arith.constant 0 : i32
    %c0_i32_2 = arith.constant 0 : i32
    return %c0_i32, %c0_i32_0, %c0_i32_1 : i32, i32, i32
  }
  func.func @transform_4(%arg0: i32) -> (i32, i32) {
    %c0_i32 = arith.constant 0 : i32
    %c0_i32_0 = arith.constant 0 : i32
    %c0_i32_1 = arith.constant 0 : i32
    return %c0_i32, %c0_i32_0 : i32, i32
  }
  func.func @transform_5(%arg0: i32) -> (i32, i32) {
    %c0_i32 = arith.constant 0 : i32
    %c0_i32_0 = arith.constant 0 : i32
    %c0_i32_1 = arith.constant 0 : i32
    return %c0_i32, %c0_i32_0 : i32, i32
  }
  func.func @transform_6(%arg0: i32) -> (i32, i32) {
    %c0_i32 = arith.constant 0 : i32
    %c0_i32_0 = arith.constant 0 : i32
    return %arg0, %c0_i32 : i32, i32
  }
}

</mosaic_0001>

<bundles_post_ra>
// kernel: _lambda_.1
= control target key start
LH: loop header
LB: loop body
LE: loop exit
PB: predicated region body
PF: predicated region fallthrough
CT: control target
= control target key end

     0   :  { %vm28_vm0 = vcmask 64512   ;;  %vm116_vm1 = vcmask 261120   ;;  %vm659_vm2 = vcmask 48128   ;;  %s1021_s2 = inlined_call_operand.vmem [shape: f32[8,32], index: 2, kind: input, shape index: {}]   ;;  %s1022_s0 = inlined_call_operand.vmem [shape: f32[16,8], index: 0, kind: input, shape index: {}]   ;;  %s1023_s1 = inlined_call_operand.vmem [shape: f32[16,32], index: 1, kind: input, shape index: {}]   ;;  %s1024_s3 = inlined_call_operand.vmem [shape: f32[4,32,32], index: 3, kind: input, shape index: {}]   ;;  %s1025_s4 = inlined_call_operand.vmem [shape: f32[9,32], index: 4, kind: input, shape index: {}]   ;;  %s1026_s5 = inlined_call_operand.vmem [shape: f32[32,6], index: 5, kind: input, shape index: {}]   ;;  %s1027_s6 = inlined_call_operand.vmem [shape: f32[16,6], index: 6, kind: output, shape index: {}]  }
   0x1   :  { %v25_v0 = vld [vmem:[%s1021_s2] sm:$0xff]  ;;  %v24_v2 = vld [vmem:[%s1022_s0 + $0x8] sm:$0xff]  ;;  %v158_v25 = vld [vmem:[%s1024_s3 + $0x10] sm:$0xff] }
   0x2   :  { %v23_v1 = vld [vmem:[%s1022_s0] sm:$0xff]  ;;  %732 = vmatprep.subr.mxu0 %v25_v0  ;;  %v27_v3 = vld [vmem:[%s1023_s1 + $0x8] sm:$0xff]  ;;  %v159_v27 = vld [vmem:[%s1024_s3 + $0x18] sm:$0xff] }
   0x3   :  { %734 = vmatprep.mubr.msk.f32.mxu0 %vm28_vm0, %v23_v1  ;;  %733 = vmatpush3.msra.mxu0 %v25_v0  ;;  %v26_v4 = vld [vmem:[%s1023_s1] sm:$0xff]  ;;  %v157_v24 = vld [vmem:[%s1024_s3 + $0x8] sm:$0xff]  ;;  %v796_v28 = vpack.c.bf16 %v159_v27, %v158_v25  ;;  %v675_v48 = vld [vmem:[%s1024_s3 + $0x30] sm:$0xff] }
   0x4   :  { %735 = vmatmul.mubr.msk.f32.vlgmr.msra.gmra.mrb[0].mxu0 %vm28_vm0, %v24_v2  ;;  %v156_v23 = vld [vmem:[%s1024_s3] sm:$0xff]  ;;  %v674_v30 = vld [vmem:[%s1024_s3 + $0x28] sm:$0xff]  ;;  %v676_v49 = vld [vmem:[%s1024_s3 + $0x38] sm:$0xff] }
   0x5   :  { %v792_v26 = vpack.c.bf16 %v157_v24, %v156_v23  ;;  %v673_v29 = vld [vmem:[%s1024_s3 + $0x20] sm:$0xff]  ;;  %v804_v50 = vpack.c.bf16 %v676_v49, %v675_v48 }
   0x6   :  { %v800_v31 = vpack.c.bf16 %v674_v30, %v673_v29  ;;  %v668_v39 = vld [vmem:[%s1025_s4] ss:$0 sm:$0xff]  ;;  %v669_v41 = vld [vmem:[%s1025_s4 + $0x1] ss:$0 sm:$0xff]  ;;  %v670_v51 = vld [vmem:[%s1025_s4 + $0x2] ss:$0 sm:$0xff] }
   0x7   :  { %793 = vmatprep.subr.bf16.mxu1 %v792_v26  ;;  %v679_v58 = vld [vmem:[%s1025_s4 + $0x3] ss:$0 sm:$0xff]  ;;  %v680_v29 = vld [vmem:[%s1025_s4 + $0x4] ss:$0 sm:$0xff] }
   0x8   :  { %795 = vmatpush3.bf16.msra.mxu1 %v792_v26  ;;  %801 = vmatprep.subr.bf16.mxu0 %v800_v31 }
   0x9   :  { %797 = vmatprep.subr.bf16.mxu1 %v796_v28  ;;  %803 = vmatpush3.bf16.msra.mxu0 %v800_v31 }
   0xa   :  { %805 = vmatprep.subr.bf16.mxu0 %v804_v50 }
   0xc   :  { %799 = vmatpush3.bf16.msra.mxu1 %v796_v28 }
   0xd   :  { %807 = vmatpush3.bf16.msra.mxu0 %v804_v50 }
  0xd7   :  { %v736_v5 = vpop.f32.mrb[0].mxu0 }
  0xd8   :  { %v101_v6 = vpop.f32.mrb[1].mxu0  ;;  %v107_v7 = vadd.f32 %v736_v5, %v27_v3 }
  0xd9   :  { %v102_v8 = vadd.f32 %v101_v6, %v26_v4 }
  0xda   :  { %v892_v10 = vmax.f32 %v107_v7, 0.0 }
  0xdb   :  { %v890_v9 = vmax.f32 %v102_v8, 0.0 }
  0xdc   :  { %v120_v12 = vsel %vm116_vm1, %v892_v10, 0.0 }
  0xdd   :  { %v117_v11 = vsel %vm116_vm1, %v890_v9, 0.0 }
  0xde   :  { %118 = vadd.xlane.f32.xlu0 %v117_v11 }
  0xe2   :  { %121 = vadd.xlane.f32.xlu0 %v120_v12 }
 0x16b   :  { %v119_v13 = vpop.xlane.xlu0 %118 }
 0x16c   :  { %v124_v14 = vmul.f32 0.03125, %v119_v13  ;;  %v682_v13 = vld [vmem:[%s1024_s3 + $0x40] sm:$0xff] }
 0x16e   :  { %v126_v15 = vsub.f32 %v890_v9, %v124_v14  ;;  %v683_v14 = vld [vmem:[%s1024_s3 + $0x48] sm:$0xff] }
 0x16f   :  { %v122_v16 = vpop.xlane.xlu0 %121 }
 0x170   :  { %v125_v17 = vmul.f32 0.03125, %v122_v16  ;;  %v128_v18 = vmul.f32 %v126_v15, %v126_v15  ;;  %v684_v16 = vld [vmem:[%s1024_s3 + $0x50] sm:$0xff] }
 0x172   :  { %v127_v19 = vsub.f32 %v892_v10, %v125_v17  ;;  %v130_v20 = vsel %vm116_vm1, %v128_v18, 0.0  ;;  %v685_v17 = vld [vmem:[%s1024_s3 + $0x58] sm:$0xff] }
 0x173   :  { %131 = vadd.xlane.f32.xlu1 %v130_v20  ;;  %v812_v18 = vpack.c.bf16 %v685_v17, %v684_v16  ;;  %v690_v20 = vld [vmem:[%s1024_s3 + $0x68] sm:$0xff] }
 0x174   :  { %v129_v21 = vmul.f32 %v127_v19, %v127_v19 }
 0x176   :  { %v133_v22 = vsel %vm116_vm1, %v129_v21, 0.0 }
 0x177   :  { %134 = vadd.xlane.f32.xlu1 %v133_v22 }
 0x200   :  { %v132_v32 = vpop.xlane.xlu1 %131 }
 0x201   :  { %v136_v33 = vmul.f32 0.03125, %v132_v32 }
 0x203   :  { %v138_v34 = vadd.f32 1e-05, %v136_v33  ;;  %v681_v33 = vld [vmem:[%s1025_s4 + $0x5] ss:$0 sm:$0xff] }
 0x204   :  { %v135_v35 = vpop.xlane.xlu1 %134 }
 0x205   :  { %832 = vrsqrt.f32 %v138_v34  ;;  %v137_v36 = vmul.f32 0.03125, %v135_v35 }
 0x207   :  { %v139_v37 = vadd.f32 1e-05, %v137_v36 }
 0x209   :  { %834 = vrsqrt.f32 %v139_v37 }
 0x20f   :  { %v833_v38 = vpop.eup %832 }
 0x210   :  { %v142_v40 = vmul.f32 %v833_v38, %v126_v15  ;;  %v808_v15 = vpack.c.bf16 %v683_v14, %v682_v13  ;;  %v691_v38 = vld [vmem:[%s1024_s3 + $0x70] sm:$0xff] }
 0x212   :  { %v148_v42 = vmul.f32 %v668_v39, %v142_v40  ;;  %809 = vmatprep.subr.bf16.mxu1 %v808_v15 }
 0x213   :  { %v835_v43 = vpop.eup %834 }
 0x214   :  { %v143_v44 = vmul.f32 %v835_v43, %v127_v19  ;;  %v154_v45 = vadd.f32 %v669_v41, %v148_v42  ;;  %v689_v19 = vld [vmem:[%s1024_s3 + $0x60] sm:$0xff]  ;;  %v570_v42 = vld [vmem:[%s1026_s5 + $0x8] sm:$0xff] }
 0x215   :  { %v816_v21 = vpack.c.bf16 %v690_v20, %v689_v19 }
 0x216   :  { %v149_v46 = vmul.f32 %v668_v39, %v143_v44  ;;  %745 = vmatprep.mubr.msk.f32.mxu1 %vm116_vm1, %v154_v45  ;;  %v692_v39 = vld [vmem:[%s1024_s3 + $0x78] sm:$0xff]  ;;  %v686_v44 = vld [vmem:[%s1025_s4 + $0x6] ss:$0 sm:$0xff] }
 0x217   :  { %817 = vmatprep.subr.bf16.mxu0 %v816_v21  ;;  %v820_v40 = vpack.c.bf16 %v692_v39, %v691_v38 }
 0x218   :  { %v155_v47 = vadd.f32 %v669_v41, %v149_v46  ;;  %v569_v41 = vld [vmem:[%s1026_s5] sm:$0xff] }
 0x219   :  { %v824_v43 = vpack.c.bf16 %v570_v42, %v569_v41 }
 0x21a   :  { %746 = vmatmul.mubr.msk.f32.vlgmr.msra.gmra.mrb[0].mxu1 %vm116_vm1, %v155_v47 }
 0x21b   :  { %811 = vmatpush3.bf16.msra.mxu1 %v808_v15 }
 0x21c   :  { %813 = vmatprep.subr.bf16.mxu1 %v812_v18 }
 0x21f   :  { %815 = vmatpush3.bf16.msra.mxu1 %v812_v18 }
 0x220   :  { %825 = vmatprep.subr.bf16.mxu1 %v824_v43 }
 0x2ed   :  { %v747_v52 = vpop.f32.mrb[0].mxu1 }
 0x2ee   :  { %v242_v53 = vadd.f32 %v747_v52, %v670_v51  ;;  %v236_v54 = vpop.f32.mrb[1].mxu1  ;;  %v572_v52 = vld [vmem:[%s1026_s5 + $0x18] sm:$0xff] }
 0x2ef   :  { %v237_v55 = vadd.f32 %v670_v51, %v236_v54  ;;  %v571_v51 = vld [vmem:[%s1026_s5 + $0x10] sm:$0xff] }
 0x2f0   :  { %v246_v57 = vmax.f32 %v242_v53, 0.0  ;;  %v828_v53 = vpack.c.bf16 %v572_v52, %v571_v51 }
 0x2f1   :  { %v245_v56 = vmax.f32 %v237_v55, 0.0  ;;  %v695_v55 = vld [vmem:[%s1025_s4 + $0x7] ss:$0 sm:$0xff] }
 0x2f3   :  { %756 = vmatprep.mubr.msk.f32.mxu0 %vm116_vm1, %v245_v56 }
 0x2f4   :  { %757 = vmatmul.mubr.msk.f32.vlgmr.msra.gmra.mrb[2].mxu0 %vm116_vm1, %v246_v57 }
 0x2f5   :  { %819 = vmatpush3.bf16.msra.mxu0 %v816_v21 }
 0x2f6   :  { %821 = vmatprep.subr.bf16.mxu0 %v820_v40 }
 0x2f9   :  { %823 = vmatpush3.bf16.msra.mxu0 %v820_v40 }
 0x3c7   :  { %v758_v59 = vpop.f32.mrb[2].mxu0 }
 0x3c8   :  { %v334_v60 = vadd.f32 %v758_v59, %v892_v10  ;;  %v324_v61 = vpop.f32.mrb[3].mxu0 }
 0x3c9   :  { %v333_v62 = vadd.f32 %v324_v61, %v890_v9  ;;  %v696_v61 = vld [vmem:[%s1025_s4 + $0x8] ss:$0 sm:$0xff] }
 0x3ca   :  { %v944_v63 = vadd.f32 %v679_v58, %v334_v60 }
 0x3cb   :  { %v946_v0 = vadd.f32 %v679_v58, %v333_v62 }
 0x3cc   :  { %v348_v1 = vsel %vm116_vm1, %v944_v63, 0.0 }
 0x3cd   :  { %349 = vadd.xlane.f32.xlu1 %v348_v1  ;;  %v345_v2 = vsel %vm116_vm1, %v946_v0, 0.0 }
 0x3ce   :  { %346 = vadd.xlane.f32.xlu0 %v345_v2 }
 0x45a   :  { %v350_v3 = vpop.xlane.xlu1 %349 }
 0x45b   :  { %v352_v4 = vmul.f32 0.03125, %v350_v3  ;;  %v347_v5 = vpop.xlane.xlu0 %346 }
 0x45c   :  { %v351_v6 = vmul.f32 0.03125, %v347_v5 }
 0x45d   :  { %v354_v7 = vsub.f32 %v944_v63, %v352_v4 }
 0x45e   :  { %v353_v8 = vsub.f32 %v946_v0, %v351_v6 }
 0x45f   :  { %v356_v9 = vmul.f32 %v354_v7, %v354_v7 }
 0x460   :  { %v355_v10 = vmul.f32 %v353_v8, %v353_v8 }
 0x461   :  { %v360_v11 = vsel %vm116_vm1, %v356_v9, 0.0 }
 0x462   :  { %361 = vadd.xlane.f32.xlu1 %v360_v11  ;;  %v357_v12 = vsel %vm116_vm1, %v355_v10, 0.0 }
 0x463   :  { %358 = vadd.xlane.f32.xlu0 %v357_v12 }
 0x4ef   :  { %v362_v22 = vpop.xlane.xlu1 %361 }
 0x4f0   :  { %v364_v23 = vmul.f32 0.03125, %v362_v22  ;;  %v359_v24 = vpop.xlane.xlu0 %358 }
 0x4f1   :  { %v363_v25 = vmul.f32 0.03125, %v359_v24 }
 0x4f2   :  { %v366_v26 = vadd.f32 1e-05, %v364_v23 }
 0x4f3   :  { %v365_v27 = vadd.f32 1e-05, %v363_v25 }
 0x4f4   :  { %836 = vrsqrt.f32 %v366_v26 }
 0x4f5   :  { %838 = vrsqrt.f32 %v365_v27 }
 0x4fe   :  { %v837_v28 = vpop.eup %836 }
 0x4ff   :  { %v839_v30 = vpop.eup %838  ;;  %v370_v31 = vmul.f32 %v837_v28, %v354_v7 }
 0x500   :  { %v369_v32 = vmul.f32 %v839_v30, %v353_v8 }
 0x501   :  { %v376_v34 = vmul.f32 %v680_v29, %v370_v31 }
 0x502   :  { %v375_v35 = vmul.f32 %v680_v29, %v369_v32 }
 0x503   :  { %v382_v37 = vadd.f32 %v681_v33, %v376_v34 }
 0x504   :  { %v381_v36 = vadd.f32 %v681_v33, %v375_v35 }
 0x506   :  { %767 = vmatprep.mubr.msk.f32.mxu1 %vm116_vm1, %v381_v36 }
 0x507   :  { %768 = vmatmul.mubr.msk.f32.vlgmr.msra.gmra.mrb[2].mxu1 %vm116_vm1, %v382_v37 }
 0x508   :  { %827 = vmatpush3.bf16.msra.mxu1 %v824_v43 }
 0x509   :  { %829 = vmatprep.subr.bf16.mxu1 %v828_v53 }
 0x50c   :  { %831 = vmatpush3.bf16.msra.mxu1 %v828_v53 }
 0x5da   :  { %v769_v45 = vpop.f32.mrb[2].mxu1 }
 0x5db   :  { %v470_v46 = vadd.f32 %v769_v45, %v686_v44  ;;  %v464_v47 = vpop.f32.mrb[3].mxu1 }
 0x5dc   :  { %v465_v48 = vadd.f32 %v686_v44, %v464_v47 }
 0x5dd   :  { %v474_v50 = vmax.f32 %v470_v46, 0.0 }
 0x5de   :  { %v473_v49 = vmax.f32 %v465_v48, 0.0 }
 0x5e0   :  { %778 = vmatprep.mubr.msk.f32.mxu0 %vm116_vm1, %v473_v49 }
 0x5e1   :  { %779 = vmatmul.mubr.msk.f32.vlgmr.msra.gmra.mrb[4].mxu0 %vm116_vm1, %v474_v50 }
 0x6b4   :  { %v780_v54 = vpop.f32.mrb[4].mxu0 }
 0x6b5   :  { %v562_v56 = vadd.f32 %v780_v54, %v944_v63  ;;  %v552_v57 = vpop.f32.mrb[5].mxu0 }
 0x6b6   :  { %v561_v58 = vadd.f32 %v552_v57, %v946_v0 }
 0x6b7   :  { %v568_v60 = vadd.f32 %v695_v55, %v562_v56 }
 0x6b8   :  { %v567_v59 = vadd.f32 %v695_v55, %v561_v58 }
 0x6ba   :  { %789 = vmatprep.mubr.msk.f32.mxu1 %vm116_vm1, %v567_v59 }
 0x6bb   :  { %790 = vmatmul.mubr.msk.f32.vlgmr.msra.gmra.mrb[4].mxu1 %vm116_vm1, %v568_v60 }
 0x78e   :  { %v791_v62 = vpop.f32.mrb[4].mxu1 }
 0x78f   :  { %v656_v1 = vadd.f32 %v791_v62, %v696_v61  ;;  %v650_v2 = vpop.f32.mrb[5].mxu1 }
 0x790   :  { %v651_v3 = vadd.f32 %v696_v61, %v650_v2 }
 0x791   :  { %661 = vst.msk [vmem:[%s1027_s6 + $0x8] sm:$0xff] %vm659_vm2, %v656_v1 }
 0x792   :  { %660 = vst.msk [vmem:[%s1027_s6] sm:$0xff] %vm659_vm2, %v651_v3 }

</bundles_post_ra>
